<compile_context>
chip_gen: v7x
topology: tpu7x:2x2x1
jax: 0.10.0
libtpu: 0.0.40
codegen_flags: <defaults>
</compile_context>

<pallas_src>
import functools

import jax
import jax.numpy as jnp
from jax.experimental import pallas as pl
from jax.experimental.pallas import tpu as pltpu

DROPOUT_P = 0.1
LANES = 128  # all feature dims (32/48/64/80) padded up to one full lane width


def _round_up(n, m):
    return ((n + m - 1) // m) * m


def _autoencoder_kernel(x_ref, m_ref,
                        w1, b1, w2, b2, w3, b3,   # encoder
                        w4, b4, w5, b5, w6, b6,   # decoder
                        out_ref):
    # ---- Dropout (mask already carries the 1/(1-p) inverted scaling) ----
    h = x_ref[...] * m_ref[...]

    def linear(a, w_ref, b_ref):
        # bf16 MXU operands, f32 accumulation, f32 bias add.
        return jnp.dot(a.astype(jnp.bfloat16), w_ref[...],
                       preferred_element_type=jnp.float32) + b_ref[...]

    # ---- Encoder: Linear -> Tanh -> Linear -> Tanh -> Linear ----
    h = jnp.tanh(linear(h, w1, b1))
    h = jnp.tanh(linear(h, w2, b2))
    z = linear(h, w3, b3)

    # ---- Decoder: Linear -> Tanh -> Linear -> Tanh -> Linear ----
    h = jnp.tanh(linear(z, w4, b4))
    h = jnp.tanh(linear(h, w5, b5))
    out_ref[...] = linear(h, w6, b6).astype(out_ref.dtype)


@functools.partial(jax.jit, static_argnames=("dim", "training", "tile_b"))
def autoencoder_forward(x, params, key, *, dim, training=True, tile_b=512):
    """x: any shape reshapeable to (-1, dim). params: list of (W, b) per Linear."""
    x2d = x.reshape(-1, dim).astype(jnp.float32)
    B = x2d.shape[0]

    # Batch tiling: keep tiles (8,128)-aligned; pad B so the grid divides evenly.
    tb = min(tile_b, _round_up(B, 8))
    B_pad = _round_up(B, tb)

    # Lane-dense, zero-padded activations.
    x_p = jnp.zeros((B_pad, LANES), jnp.float32).at[:B, :dim].set(x2d)

    # Dropout keep-mask with inverted scale folded in (training-mode nn.Dropout).
    if training:
        keep = jax.random.bernoulli(key, 1.0 - DROPOUT_P, (B_pad, LANES))
        mask = keep.astype(jnp.float32) * (1.0 / (1.0 - DROPOUT_P))
    else:
        mask = jnp.ones((B_pad, LANES), jnp.float32)

    # Zero-pad weights/biases to (128,128)/(1,128); weights as bf16 MXU operands.
    flat_params = []
    for (w, b) in params:
        fi, fo = w.shape
        wp = jnp.zeros((LANES, LANES), jnp.float32).at[:fi, :fo].set(w)
        bp = jnp.zeros((1, LANES), jnp.float32).at[0, :fo].set(b.reshape(-1))
        flat_params += [wp.astype(jnp.bfloat16), bp]

    grid = (B_pad // tb,)
    row_spec = pl.BlockSpec((tb, LANES), lambda i: (i, 0))       # x / mask / out
    w_spec = pl.BlockSpec((LANES, LANES), lambda i: (0, 0))      # resident weights
    b_spec = pl.BlockSpec((1, LANES), lambda i: (0, 0))          # resident biases
    param_specs = [w_spec, b_spec] * (len(flat_params) // 2)

    out = pl.pallas_call(
        _autoencoder_kernel,
        out_shape=jax.ShapeDtypeStruct((B_pad, LANES), jnp.float32),
        grid=grid,
        in_specs=[row_spec, row_spec] + param_specs,
        out_specs=row_spec,
        compiler_params=pltpu.CompilerParams(
            dimension_semantics=("parallel",),
            vmem_limit_bytes=32 * 1024 * 1024),
    )(x_p, mask, *flat_params)

    return out[:B, :dim]


def init_params(key, dim, theta):
    """Deterministic init mimicking nn.Linear (uniform +/- 1/sqrt(fan_in))."""
    sizes = [dim + theta * i for i in range(4)]                      # 32,48,64,80
    layer_dims = (list(zip(sizes[:-1], sizes[1:]))                    # encoder
                  + list(zip(sizes[::-1][:-1], sizes[::-1][1:])))     # decoder
    params = []
    for (fan_in, fan_out) in layer_dims:
        key, kw, kb = jax.random.split(key, 3)
        bound = 1.0 / jnp.sqrt(fan_in)
        w = jax.random.uniform(kw, (fan_in, fan_out), jnp.float32, -bound, bound)
        b = jax.random.uniform(kb, (fan_out,), jnp.float32, -bound, bound)
        params.append((w, b))
    return params


if __name__ == "__main__":
    dim, theta = 32, 16
    key = jax.random.PRNGKey(0)
    kx, kp, kd = jax.random.split(key, 3)

    # small input consistent with forward's x.view(-1, dim): (2, 4, 32) -> (8, 32)
    x = jax.random.normal(kx, (2, 4, dim), jnp.float32)
    params = init_params(kp, dim, theta)

    out = autoencoder_forward(x, params, kd, dim=dim)
    out = jax.block_until_ready(out)
    assert out.shape == (8, dim), out.shape
    assert bool(jnp.all(jnp.isfinite(out)))
    print("KERNEL_OK")
</pallas_src>

<mosaic_0001>
module attributes {stable_mosaic.version = 11 : i64} {
  func.func @_autoencoder_kernel(%arg0: i32, %arg1: memref<8x128xf32, #tpu.memory_space<vmem>>, %arg2: memref<8x128xf32, #tpu.memory_space<vmem>>, %arg3: memref<128x128xbf16, #tpu.memory_space<vmem>>, %arg4: memref<1x128xf32, #tpu.memory_space<vmem>>, %arg5: memref<128x128xbf16, #tpu.memory_space<vmem>>, %arg6: memref<1x128xf32, #tpu.memory_space<vmem>>, %arg7: memref<128x128xbf16, #tpu.memory_space<vmem>>, %arg8: memref<1x128xf32, #tpu.memory_space<vmem>>, %arg9: memref<128x128xbf16, #tpu.memory_space<vmem>>, %arg10: memref<1x128xf32, #tpu.memory_space<vmem>>, %arg11: memref<128x128xbf16, #tpu.memory_space<vmem>>, %arg12: memref<1x128xf32, #tpu.memory_space<vmem>>, %arg13: memref<128x128xbf16, #tpu.memory_space<vmem>>, %arg14: memref<1x128xf32, #tpu.memory_space<vmem>>, %arg15: memref<8x128xf32, #tpu.memory_space<vmem>>) attributes {dimension_semantics = [#tpu.dimension_semantics<parallel>], iteration_bounds = array<i64: 1>, scalar_prefetch = 0 : i64, scratch_operands = 0 : i64, tpu.core_type = #tpu.core_type<tc>, window_params = [{transform_indices = @transform_0, window_bounds = array<i64: 8, 128>}, {transform_indices = @transform_1, window_bounds = array<i64: 8, 128>}, {pipeline_mode = #tpu.pipeline_mode<synchronous>, transform_indices = @transform_2, window_bounds = array<i64: 128, 128>}, {pipeline_mode = #tpu.pipeline_mode<synchronous>, transform_indices = @transform_3, window_bounds = array<i64: 1, 128>}, {pipeline_mode = #tpu.pipeline_mode<synchronous>, transform_indices = @transform_4, window_bounds = array<i64: 128, 128>}, {pipeline_mode = #tpu.pipeline_mode<synchronous>, transform_indices = @transform_5, window_bounds = array<i64: 1, 128>}, {pipeline_mode = #tpu.pipeline_mode<synchronous>, transform_indices = @transform_6, window_bounds = array<i64: 128, 128>}, {pipeline_mode = #tpu.pipeline_mode<synchronous>, transform_indices = @transform_7, window_bounds = array<i64: 1, 128>}, {pipeline_mode = #tpu.pipeline_mode<synchronous>, transform_indices = @transform_8, window_bounds = array<i64: 128, 128>}, {pipeline_mode = #tpu.pipeline_mode<synchronous>, transform_indices = @transform_9, window_bounds = array<i64: 1, 128>}, {pipeline_mode = #tpu.pipeline_mode<synchronous>, transform_indices = @transform_10, window_bounds = array<i64: 128, 128>}, {pipeline_mode = #tpu.pipeline_mode<synchronous>, transform_indices = @transform_11, window_bounds = array<i64: 1, 128>}, {pipeline_mode = #tpu.pipeline_mode<synchronous>, transform_indices = @transform_12, window_bounds = array<i64: 128, 128>}, {pipeline_mode = #tpu.pipeline_mode<synchronous>, transform_indices = @transform_13, window_bounds = array<i64: 1, 128>}, {transform_indices = @transform_14, window_bounds = array<i64: 8, 128>}]} {
    %c0 = arith.constant 0 : index
    %c0_0 = arith.constant 0 : index
    %0 = vector.load %arg1[%c0, %c0_0] : memref<8x128xf32, #tpu.memory_space<vmem>>, vector<8x128xf32>
    %c0_1 = arith.constant 0 : index
    %c0_2 = arith.constant 0 : index
    %1 = vector.load %arg2[%c0_1, %c0_2] : memref<8x128xf32, #tpu.memory_space<vmem>>, vector<8x128xf32>
    %2 = arith.mulf %0, %1 : vector<8x128xf32>
    %3 = arith.truncf %2 : vector<8x128xf32> to vector<8x128xbf16>
    %c0_3 = arith.constant 0 : index
    %c0_4 = arith.constant 0 : index
    %4 = vector.load %arg3[%c0_3, %c0_4] : memref<128x128xbf16, #tpu.memory_space<vmem>>, vector<128x128xbf16>
    %cst = arith.constant dense<0.000000e+00> : vector<8x128xf32>
    %5 = tpu.matmul %3, %4, %cst {dimension_numbers = #tpu.dot_dimension_numbers<[1], [0], [0], [1], [0, 0, 1, 1], [], []>} : vector<8x128xbf16>, vector<128x128xbf16>, vector<8x128xf32> -> vector<8x128xf32>
    %c0_5 = arith.constant 0 : index
    %c0_6 = arith.constant 0 : index
    %6 = vector.load %arg4[%c0_5, %c0_6] : memref<1x128xf32, #tpu.memory_space<vmem>>, vector<1x128xf32>
    %7 = vector.broadcast %6 : vector<1x128xf32> to vector<8x128xf32>
    %8 = arith.addf %5, %7 : vector<8x128xf32>
    %9 = math.tanh %8 : vector<8x128xf32>
    %10 = arith.truncf %9 : vector<8x128xf32> to vector<8x128xbf16>
    %c0_7 = arith.constant 0 : index
    %c0_8 = arith.constant 0 : index
    %11 = vector.load %arg5[%c0_7, %c0_8] : memref<128x128xbf16, #tpu.memory_space<vmem>>, vector<128x128xbf16>
    %cst_9 = arith.constant dense<0.000000e+00> : vector<8x128xf32>
    %12 = tpu.matmul %10, %11, %cst_9 {dimension_numbers = #tpu.dot_dimension_numbers<[1], [0], [0], [1], [0, 0, 1, 1], [], []>} : vector<8x128xbf16>, vector<128x128xbf16>, vector<8x128xf32> -> vector<8x128xf32>
    %c0_10 = arith.constant 0 : index
    %c0_11 = arith.constant 0 : index
    %13 = vector.load %arg6[%c0_10, %c0_11] : memref<1x128xf32, #tpu.memory_space<vmem>>, vector<1x128xf32>
    %14 = vector.broadcast %13 : vector<1x128xf32> to vector<8x128xf32>
    %15 = arith.addf %12, %14 : vector<8x128xf32>
    %16 = math.tanh %15 : vector<8x128xf32>
    %17 = arith.truncf %16 : vector<8x128xf32> to vector<8x128xbf16>
    %c0_12 = arith.constant 0 : index
    %c0_13 = arith.constant 0 : index
    %18 = vector.load %arg7[%c0_12, %c0_13] : memref<128x128xbf16, #tpu.memory_space<vmem>>, vector<128x128xbf16>
    %cst_14 = arith.constant dense<0.000000e+00> : vector<8x128xf32>
    %19 = tpu.matmul %17, %18, %cst_14 {dimension_numbers = #tpu.dot_dimension_numbers<[1], [0], [0], [1], [0, 0, 1, 1], [], []>} : vector<8x128xbf16>, vector<128x128xbf16>, vector<8x128xf32> -> vector<8x128xf32>
    %c0_15 = arith.constant 0 : index
    %c0_16 = arith.constant 0 : index
    %20 = vector.load %arg8[%c0_15, %c0_16] : memref<1x128xf32, #tpu.memory_space<vmem>>, vector<1x128xf32>
    %21 = vector.broadcast %20 : vector<1x128xf32> to vector<8x128xf32>
    %22 = arith.addf %19, %21 : vector<8x128xf32>
    %23 = arith.truncf %22 : vector<8x128xf32> to vector<8x128xbf16>
    %c0_17 = arith.constant 0 : index
    %c0_18 = arith.constant 0 : index
    %24 = vector.load %arg9[%c0_17, %c0_18] : memref<128x128xbf16, #tpu.memory_space<vmem>>, vector<128x128xbf16>
    %cst_19 = arith.constant dense<0.000000e+00> : vector<8x128xf32>
    %25 = tpu.matmul %23, %24, %cst_19 {dimension_numbers = #tpu.dot_dimension_numbers<[1], [0], [0], [1], [0, 0, 1, 1], [], []>} : vector<8x128xbf16>, vector<128x128xbf16>, vector<8x128xf32> -> vector<8x128xf32>
    %c0_20 = arith.constant 0 : index
    %c0_21 = arith.constant 0 : index
    %26 = vector.load %arg10[%c0_20, %c0_21] : memref<1x128xf32, #tpu.memory_space<vmem>>, vector<1x128xf32>
    %27 = vector.broadcast %26 : vector<1x128xf32> to vector<8x128xf32>
    %28 = arith.addf %25, %27 : vector<8x128xf32>
    %29 = math.tanh %28 : vector<8x128xf32>
    %30 = arith.truncf %29 : vector<8x128xf32> to vector<8x128xbf16>
    %c0_22 = arith.constant 0 : index
    %c0_23 = arith.constant 0 : index
    %31 = vector.load %arg11[%c0_22, %c0_23] : memref<128x128xbf16, #tpu.memory_space<vmem>>, vector<128x128xbf16>
    %cst_24 = arith.constant dense<0.000000e+00> : vector<8x128xf32>
    %32 = tpu.matmul %30, %31, %cst_24 {dimension_numbers = #tpu.dot_dimension_numbers<[1], [0], [0], [1], [0, 0, 1, 1], [], []>} : vector<8x128xbf16>, vector<128x128xbf16>, vector<8x128xf32> -> vector<8x128xf32>
    %c0_25 = arith.constant 0 : index
    %c0_26 = arith.constant 0 : index
    %33 = vector.load %arg12[%c0_25, %c0_26] : memref<1x128xf32, #tpu.memory_space<vmem>>, vector<1x128xf32>
    %34 = vector.broadcast %33 : vector<1x128xf32> to vector<8x128xf32>
    %35 = arith.addf %32, %34 : vector<8x128xf32>
    %36 = math.tanh %35 : vector<8x128xf32>
    %37 = arith.truncf %36 : vector<8x128xf32> to vector<8x128xbf16>
    %c0_27 = arith.constant 0 : index
    %c0_28 = arith.constant 0 : index
    %38 = vector.load %arg13[%c0_27, %c0_28] : memref<128x128xbf16, #tpu.memory_space<vmem>>, vector<128x128xbf16>
    %cst_29 = arith.constant dense<0.000000e+00> : vector<8x128xf32>
    %39 = tpu.matmul %37, %38, %cst_29 {dimension_numbers = #tpu.dot_dimension_numbers<[1], [0], [0], [1], [0, 0, 1, 1], [], []>} : vector<8x128xbf16>, vector<128x128xbf16>, vector<8x128xf32> -> vector<8x128xf32>
    %c0_30 = arith.constant 0 : index
    %c0_31 = arith.constant 0 : index
    %40 = vector.load %arg14[%c0_30, %c0_31] : memref<1x128xf32, #tpu.memory_space<vmem>>, vector<1x128xf32>
    %41 = vector.broadcast %40 : vector<1x128xf32> to vector<8x128xf32>
    %42 = arith.addf %39, %41 : vector<8x128xf32>
    %c0_32 = arith.constant 0 : index
    %c0_33 = arith.constant 0 : index
    %43 = vector.load %arg15[%c0_32, %c0_33] : memref<8x128xf32, #tpu.memory_space<vmem>>, vector<8x128xf32>
    tpu.vector_store %arg15[%c0_32, %c0_33], %42 {strides = array<i32>} : memref<8x128xf32, #tpu.memory_space<vmem>>, vector<8x128xf32>,
    return
  }
  func.func @transform_0(%arg0: i32) -> (i32, i32) {
    %c0_i32 = arith.constant 0 : i32
    %c0_i32_0 = arith.constant 0 : i32
    return %arg0, %c0_i32 : i32, i32
  }
  func.func @transform_1(%arg0: i32) -> (i32, i32) {
    %c0_i32 = arith.constant 0 : i32
    %c0_i32_0 = arith.constant 0 : i32
    return %arg0, %c0_i32 : i32, i32
  }
  func.func @transform_2(%arg0: i32) -> (i32, i32) {
    %c0_i32 = arith.constant 0 : i32
    %c0_i32_0 = arith.constant 0 : i32
    %c0_i32_1 = arith.constant 0 : i32
    return %c0_i32, %c0_i32_0 : i32, i32
  }
  func.func @transform_3(%arg0: i32) -> (i32, i32) {
    %c0_i32 = arith.constant 0 : i32
    %c0_i32_0 = arith.constant 0 : i32
    %c0_i32_1 = arith.constant 0 : i32
    return %c0_i32, %c0_i32_0 : i32, i32
  }
  func.func @transform_4(%arg0: i32) -> (i32, i32) {
    %c0_i32 = arith.constant 0 : i32
    %c0_i32_0 = arith.constant 0 : i32
    %c0_i32_1 = arith.constant 0 : i32
    return %c0_i32, %c0_i32_0 : i32, i32
  }
  func.func @transform_5(%arg0: i32) -> (i32, i32) {
    %c0_i32 = arith.constant 0 : i32
    %c0_i32_0 = arith.constant 0 : i32
    %c0_i32_1 = arith.constant 0 : i32
    return %c0_i32, %c0_i32_0 : i32, i32
  }
  func.func @transform_6(%arg0: i32) -> (i32, i32) {
    %c0_i32 = arith.constant 0 : i32
    %c0_i32_0 = arith.constant 0 : i32
    %c0_i32_1 = arith.constant 0 : i32
    return %c0_i32, %c0_i32_0 : i32, i32
  }
  func.func @transform_7(%arg0: i32) -> (i32, i32) {
    %c0_i32 = arith.constant 0 : i32
    %c0_i32_0 = arith.constant 0 : i32
    %c0_i32_1 = arith.constant 0 : i32
    return %c0_i32, %c0_i32_0 : i32, i32
  }
  func.func @transform_8(%arg0: i32) -> (i32, i32) {
    %c0_i32 = arith.constant 0 : i32
    %c0_i32_0 = arith.constant 0 : i32
    %c0_i32_1 = arith.constant 0 : i32
    return %c0_i32, %c0_i32_0 : i32, i32
  }
  func.func @transform_9(%arg0: i32) -> (i32, i32) {
    %c0_i32 = arith.constant 0 : i32
    %c0_i32_0 = arith.constant 0 : i32
    %c0_i32_1 = arith.constant 0 : i32
    return %c0_i32, %c0_i32_0 : i32, i32
  }
  func.func @transform_10(%arg0: i32) -> (i32, i32) {
    %c0_i32 = arith.constant 0 : i32
    %c0_i32_0 = arith.constant 0 : i32
    %c0_i32_1 = arith.constant 0 : i32
    return %c0_i32, %c0_i32_0 : i32, i32
  }
  func.func @transform_11(%arg0: i32) -> (i32, i32) {
    %c0_i32 = arith.constant 0 : i32
    %c0_i32_0 = arith.constant 0 : i32
    %c0_i32_1 = arith.constant 0 : i32
    return %c0_i32, %c0_i32_0 : i32, i32
  }
  func.func @transform_12(%arg0: i32) -> (i32, i32) {
    %c0_i32 = arith.constant 0 : i32
    %c0_i32_0 = arith.constant 0 : i32
    %c0_i32_1 = arith.constant 0 : i32
    return %c0_i32, %c0_i32_0 : i32, i32
  }
  func.func @transform_13(%arg0: i32) -> (i32, i32) {
    %c0_i32 = arith.constant 0 : i32
    %c0_i32_0 = arith.constant 0 : i32
    %c0_i32_1 = arith.constant 0 : i32
    return %c0_i32, %c0_i32_0 : i32, i32
  }
  func.func @transform_14(%arg0: i32) -> (i32, i32) {
    %c0_i32 = arith.constant 0 : i32
    %c0_i32_0 = arith.constant 0 : i32
    return %arg0, %c0_i32 : i32, i32
  }
}

</mosaic_0001>

<bundles_post_ra>
// kernel: autoencoder_forward.1
= control target key start
LH: loop header
LB: loop body
LE: loop exit
PB: predicated region body
PF: predicated region fallthrough
CT: control target
= control target key end

     0   :  { %v1054_v1 = vmov 0.0   ;;  %vm1055_vm0 = vmmov 0   ;;  %s1372_s0 = inlined_call_operand.vmem [shape: f32[8,128], index: 0, kind: input, shape index: {}]   ;;  %s1373_s1 = inlined_call_operand.vmem [shape: f32[8,128], index: 1, kind: input, shape index: {}]   ;;  %s1374_s2 = inlined_call_operand.vmem [shape: bf16[128,128], index: 2, kind: input, shape index: {}]   ;;  %s1375_s3 = inlined_call_operand.vmem [shape: f32[1,128], index: 3, kind: input, shape index: {}]   ;;  %s1376_s4 = inlined_call_operand.vmem [shape: bf16[128,128], index: 4, kind: input, shape index: {}]   ;;  %s1377_s5 = inlined_call_operand.vmem [shape: f32[1,128], index: 5, kind: input, shape index: {}]   ;;  %s1378_s6 = inlined_call_operand.vmem [shape: bf16[128,128], index: 6, kind: input, shape index: {}]   ;;  %s1379_s7 = inlined_call_operand.vmem [shape: f32[1,128], index: 7, kind: input, shape index: {}]   ;;  %s1380_s8 = inlined_call_operand.vmem [shape: bf16[128,128], index: 8, kind: input, shape index: {}]   ;;  %s1381_s9 = inlined_call_operand.vmem [shape: f32[1,128], index: 9, kind: input, shape index: {}]   ;;  %s1382_s10 = inlined_call_operand.vmem [shape: bf16[128,128], index: 10, kind: input, shape index: {}]   ;;  %s1383_s11 = inlined_call_operand.vmem [shape: f32[1,128], index: 11, kind: input, shape index: {}]   ;;  %s1384_s12 = inlined_call_operand.vmem [shape: bf16[128,128], index: 12, kind: input, shape index: {}]   ;;  %s1385_s13 = inlined_call_operand.vmem [shape: f32[1,128], index: 13, kind: input, shape index: {}]   ;;  %s1386_s14 = inlined_call_operand.hbm [shape: f32[8,128], index: 14, kind: output, shape index: {}]  }
   0x1   :  { %v974_v0 = vld [vmem:[%s1374_s2] sm:$0xff]   ;;  %851 = vmatprep.subr.bf16.mxu0 %v1054_v1  ;;  %871 = vmatprep.subr.bf16.mxu1 %v1054_v1  ;;  %v975_v2 = vld [vmem:[%s1374_s2 + $0x8] sm:$0xff]   ;;  %v976_v3 = vld [vmem:[%s1374_s2 + $0x10] sm:$0xff]  }
   0x2   :  { %852 = vmatpush3.bf16.msra.mxu0 %v974_v0  ;;  %867 = vmatprep.mubr.msk.bf16.mxu0 %vm1055_vm0, %v1054_v1  ;;  %v982_v4 = vld [vmem:[%s1376_s4] sm:$0xff]   ;;  %v977_v5 = vld [vmem:[%s1374_s2 + $0x18] sm:$0xff]   ;;  %v983_v6 = vld [vmem:[%s1376_s4 + $0x8] sm:$0xff]  }
   0x3   :  { %853 = vmatprep.subr.bf16.mxu0 %v1054_v1  ;;  %887 = vmatprep.mubr.msk.bf16.mxu1 %vm1055_vm0, %v1054_v1  ;;  %v978_v7 = vld [vmem:[%s1374_s2 + $0x20] sm:$0xff]   ;;  %v984_v8 = vld [vmem:[%s1376_s4 + $0x10] sm:$0xff]   ;;  %v979_v9 = vld [vmem:[%s1374_s2 + $0x28] sm:$0xff]  }
   0x4   :  { %872 = vmatpush3.bf16.msra.mxu1 %v982_v4  ;;  %v985_v10 = vld [vmem:[%s1376_s4 + $0x18] sm:$0xff]   ;;  %v980_v11 = vld [vmem:[%s1374_s2 + $0x30] sm:$0xff]   ;;  %v49_v12 = vld [vmem:[%s1372_s0] sm:$0xff] }
   0x5   :  { %873 = vmatprep.subr.bf16.mxu1 %v1054_v1  ;;  %v50_v13 = vld [vmem:[%s1373_s1] sm:$0xff]  ;;  %v981_v14 = vld [vmem:[%s1374_s2 + $0x38] sm:$0xff]  }
   0x6   :  { %854 = vmatpush3.bf16.msra.mxu0 %v975_v2  ;;  %v51_v15 = vmul.f32 %v50_v13, %v49_v12 }
   0x7   :  { %855 = vmatprep.subr.bf16.mxu0 %v1054_v1 }
   0x8   :  { %874 = vmatpush3.bf16.msra.mxu1 %v983_v6  ;;  %v52_v16 = vpack.c.bf16 %v51_v15, %v51_v15 }
   0x9   :  { %875 = vmatprep.subr.bf16.mxu1 %v1054_v1 }
   0xa   :  { %856 = vmatpush3.bf16.msra.mxu0 %v976_v3 }
   0xb   :  { %857 = vmatprep.subr.bf16.mxu0 %v1054_v1 }
   0xc   :  { %876 = vmatpush3.bf16.msra.mxu1 %v984_v8 }
   0xd   :  { %877 = vmatprep.subr.bf16.mxu1 %v1054_v1 }
   0xe   :  { %858 = vmatpush3.bf16.msra.mxu0 %v977_v5 }
   0xf   :  { %859 = vmatprep.subr.bf16.mxu0 %v1054_v1 }
  0x10   :  { %878 = vmatpush3.bf16.msra.mxu1 %v985_v10 }
  0x11   :  { %879 = vmatprep.subr.bf16.mxu1 %v1054_v1 }
  0x12   :  { %860 = vmatpush3.bf16.msra.mxu0 %v978_v7 }
  0x13   :  { %861 = vmatprep.subr.bf16.mxu0 %v1054_v1 }
  0x16   :  { %862 = vmatpush3.bf16.msra.mxu0 %v979_v9 }
  0x17   :  { %863 = vmatprep.subr.bf16.mxu0 %v1054_v1 }
  0x1a   :  { %864 = vmatpush3.bf16.msra.mxu0 %v980_v11 }
  0x1b   :  { %865 = vmatprep.subr.bf16.mxu0 %v1054_v1 }
  0x1e   :  { %866 = vmatpush3.bf16.msra.mxu0 %v981_v14 }
  0x1f   :  { %891 = vmatprep.subr.bf16.mxu0 %v1054_v1 }
  0x21   :  { %868 = vmatmul.mubr.bf16.vlgmr.msra.gmra.mrb[0].mxu0 %v52_v16 }
  0x22   :  { %907 = vmatprep.mubr.msk.bf16.mxu0 %vm1055_vm0, %v1054_v1 }
  0x23   :  { %19 = vsyncpa [#allocation3], 0  ;;  %v986_v17 = vld [vmem:[%s1376_s4 + $0x20] sm:$0xff]   ;;  %v987_v18 = vld [vmem:[%s1376_s4 + $0x28] sm:$0xff]   ;;  %s1056_s17 = smov [#allocation2]  }
  0x24   :  { %880 = vmatpush3.bf16.msra.mxu1 %v986_v17  ;;  %v988_v19 = vld [vmem:[%s1376_s4 + $0x30] sm:$0xff]   ;;  %v989_v20 = vld [vmem:[%s1376_s4 + $0x38] sm:$0xff]   ;;  %v990_v21 = vld [vmem:[%s1378_s6] sm:$0xff]  }
  0x25   :  { %881 = vmatprep.subr.bf16.mxu1 %v1054_v1  ;;  %892 = vmatpush3.bf16.msra.mxu0 %v990_v21  ;;  %v991_v22 = vld [vmem:[%s1378_s6 + $0x8] sm:$0xff]   ;;  %v992_v23 = vld [vmem:[%s1378_s6 + $0x10] sm:$0xff]   ;;  %v993_v24 = vld [vmem:[%s1378_s6 + $0x18] sm:$0xff]  }
  0x26   :  { %893 = vmatprep.subr.bf16.mxu0 %v1054_v1  ;;  %v743_v25 = vld [vmem:[%s1375_s3] ss:$0 sm:$0xff]  ;;  %v995_v34 = vld [vmem:[%s1378_s6 + $0x28] sm:$0xff]   ;;  %v996_v35 = vld [vmem:[%s1378_s6 + $0x30] sm:$0xff]  }
  0x27   :  { %v994_v33 = vld [vmem:[%s1378_s6 + $0x20] sm:$0xff]   ;;  %v997_v36 = vld [vmem:[%s1378_s6 + $0x38] sm:$0xff]   ;;  %v999_v38 = vld [vmem:[%s1380_s8 + $0x8] sm:$0xff]  }
  0x28   :  { %882 = vmatpush3.bf16.msra.mxu1 %v987_v18  ;;  %v998_v37 = vld [vmem:[%s1380_s8] sm:$0xff]   ;;  %v1000_v39 = vld [vmem:[%s1380_s8 + $0x10] sm:$0xff]   ;;  %v1001_v40 = vld [vmem:[%s1380_s8 + $0x18] sm:$0xff]  }
  0x29   :  { %883 = vmatprep.subr.bf16.mxu1 %v1054_v1  ;;  %894 = vmatpush3.bf16.msra.mxu0 %v991_v22  ;;  %v1002_v41 = vld [vmem:[%s1380_s8 + $0x20] sm:$0xff]   ;;  %v1003_v42 = vld [vmem:[%s1380_s8 + $0x28] sm:$0xff]   ;;  %v1004_v43 = vld [vmem:[%s1380_s8 + $0x30] sm:$0xff]  }
  0x2a   :  { %895 = vmatprep.subr.bf16.mxu0 %v1054_v1  ;;  %v752_v44 = vld [vmem:[%s1377_s5] ss:$0 sm:$0xff]  ;;  %v1005_v52 = vld [vmem:[%s1380_s8 + $0x38] sm:$0xff]   ;;  %v1007_v54 = vld [vmem:[%s1382_s10 + $0x8] sm:$0xff]  }
  0x2b   :  { %v1006_v53 = vld [vmem:[%s1382_s10] sm:$0xff]   ;;  %v1008_v55 = vld [vmem:[%s1382_s10 + $0x10] sm:$0xff]   ;;  %v1009_v56 = vld [vmem:[%s1382_s10 + $0x18] sm:$0xff]  }
  0x2c   :  { %884 = vmatpush3.bf16.msra.mxu1 %v988_v19  ;;  %v761_v57 = vld [vmem:[%s1379_s7] ss:$0 sm:$0xff]  ;;  %v1011_v2 = vld [vmem:[%s1382_s10 + $0x28] sm:$0xff]   ;;  %v1012_v3 = vld [vmem:[%s1382_s10 + $0x30] sm:$0xff]  }
  0x2d   :  { %885 = vmatprep.subr.bf16.mxu1 %v1054_v1  ;;  %896 = vmatpush3.bf16.msra.mxu0 %v992_v23  ;;  %v1010_v0 = vld [vmem:[%s1382_s10 + $0x20] sm:$0xff]   ;;  %v1013_v4 = vld [vmem:[%s1382_s10 + $0x38] sm:$0xff]   ;;  %v1015_v6 = vld [vmem:[%s1384_s12 + $0x8] sm:$0xff]  }
  0x2e   :  { %897 = vmatprep.subr.bf16.mxu0 %v1054_v1  ;;  %v1014_v5 = vld [vmem:[%s1384_s12] sm:$0xff]   ;;  %v1016_v7 = vld [vmem:[%s1384_s12 + $0x10] sm:$0xff]   ;;  %v1017_v8 = vld [vmem:[%s1384_s12 + $0x18] sm:$0xff]  }
  0x2f   :  { %v770_v9 = vld [vmem:[%s1381_s9] ss:$0 sm:$0xff]  ;;  %v1019_v18 = vld [vmem:[%s1384_s12 + $0x28] sm:$0xff]   ;;  %v1020_v19 = vld [vmem:[%s1384_s12 + $0x30] sm:$0xff]  }
  0x30   :  { %886 = vmatpush3.bf16.msra.mxu1 %v989_v20  ;;  %v1018_v17 = vld [vmem:[%s1384_s12 + $0x20] sm:$0xff]   ;;  %v1021_v20 = vld [vmem:[%s1384_s12 + $0x38] sm:$0xff]   ;;  %s735_s12 = sshll.u32 %s1056_s17, 4  ;;  %s736_s12 = int_to_ptr.vmem [resolvable:$true] %s735_s12 }
  0x31   :  { %911 = vmatprep.subr.bf16.mxu1 %v1054_v1  ;;  %898 = vmatpush3.bf16.msra.mxu0 %v993_v24  ;;  %v779_v21 = vld [vmem:[%s1383_s11] ss:$0 sm:$0xff]  ;;  %s1030_s11 = scalar_lea.vmem %s736_s12, 128  ;;  %p1035_p1 = scmp.lt.s32.totalorder %s736_s12, %s736_s12 }
  0x32   :  { %899 = vmatprep.subr.bf16.mxu0 %v1054_v1  ;;  %p1031_p0 = scmp.ne.s32.totalorder %s736_s12, %s1030_s11  ;;  %p1036_p2 = scmp.lt.s32.totalorder %s1030_s11, %s1030_s11 }
  0x34   :  { %p1037_p3 = por %p1036_p2, %p1035_p1 }
  0x35   :  { %900 = vmatpush3.bf16.msra.mxu0 %v994_v33 }
  0x36   :  { %901 = vmatprep.subr.bf16.mxu0 %v1054_v1  ;;  %p1038_p4 = pnand %p1037_p3, %p1031_p0 }
  0x39   :  { %902 = vmatpush3.bf16.msra.mxu0 %v995_v34 }
  0x3a   :  { %903 = vmatprep.subr.bf16.mxu0 %v1054_v1 }
  0x3d   :  { %904 = vmatpush3.bf16.msra.mxu0 %v996_v35 }
  0x3e   :  { %905 = vmatprep.subr.bf16.mxu0 %v1054_v1 }
  0x41   :  { %906 = vmatpush3.bf16.msra.mxu0 %v997_v36 }
  0x42   :  { %931 = vmatprep.subr.bf16.mxu0 %v1054_v1 }
  0xf4   :  { %v158_v26 = vpop.f32.mrb[0].mxu0 }
  0xf5   :  { %v159_v27 = vadd.f32 %v743_v25, %v158_v26  ;;  %v869_v28 = vpop.f32.mrb[1].mxu0 }
  0xf6   :  { %v161_v29 = vpop.f32.mrb[2].mxu0 }
  0xf7   :  { %1022 = vtanh.f32 %v159_v27  ;;  %v870_v30 = vpop.f32.mrb[3].mxu0 }
 0x101   :  { %v1023_v31 = vpop.eup %1022 }
 0x102   :  { %v165_v32 = vpack.c.bf16 %v1023_v31, %v1023_v31 }
 0x104   :  { %888 = vmatmul.mubr.bf16.vlgmr.msra.gmra.mrb[0].mxu1 %v165_v32 }
 0x105   :  { %927 = vmatprep.mubr.msk.bf16.mxu1 %vm1055_vm0, %v1054_v1  ;;  %912 = vmatpush3.bf16.msra.mxu1 %v998_v37 }
 0x106   :  { %913 = vmatprep.subr.bf16.mxu1 %v1054_v1 }
 0x109   :  { %914 = vmatpush3.bf16.msra.mxu1 %v999_v38 }
 0x10a   :  { %915 = vmatprep.subr.bf16.mxu1 %v1054_v1 }
 0x10d   :  { %916 = vmatpush3.bf16.msra.mxu1 %v1000_v39 }
 0x10e   :  { %917 = vmatprep.subr.bf16.mxu1 %v1054_v1 }
 0x111   :  { %918 = vmatpush3.bf16.msra.mxu1 %v1001_v40 }
 0x112   :  { %919 = vmatprep.subr.bf16.mxu1 %v1054_v1 }
 0x115   :  { %920 = vmatpush3.bf16.msra.mxu1 %v1002_v41 }
 0x116   :  { %921 = vmatprep.subr.bf16.mxu1 %v1054_v1 }
 0x119   :  { %922 = vmatpush3.bf16.msra.mxu1 %v1003_v42 }
 0x11a   :  { %923 = vmatprep.subr.bf16.mxu1 %v1054_v1 }
 0x11d   :  { %924 = vmatpush3.bf16.msra.mxu1 %v1004_v43 }
 0x11e   :  { %925 = vmatprep.subr.bf16.mxu1 %v1054_v1 }
 0x121   :  { %926 = vmatpush3.bf16.msra.mxu1 %v1005_v52 }
 0x122   :  { %951 = vmatprep.subr.bf16.mxu1 %v1054_v1 }
 0x1d7   :  { %v271_v45 = vpop.f32.mrb[0].mxu1 }
 0x1d8   :  { %v272_v46 = vadd.f32 %v752_v44, %v271_v45  ;;  %v889_v47 = vpop.f32.mrb[1].mxu1 }
 0x1d9   :  { %v274_v48 = vpop.f32.mrb[2].mxu1 }
 0x1da   :  { %1024 = vtanh.f32 %v272_v46  ;;  %v890_v49 = vpop.f32.mrb[3].mxu1 }
 0x1e4   :  { %v1025_v50 = vpop.eup %1024 }
 0x1e5   :  { %v278_v51 = vpack.c.bf16 %v1025_v50, %v1025_v50 }
 0x1e7   :  { %908 = vmatmul.mubr.bf16.vlgmr.msra.gmra.mrb[4].mxu0 %v278_v51 }
 0x1e8   :  { %947 = vmatprep.mubr.msk.bf16.mxu0 %vm1055_vm0, %v1054_v1  ;;  %932 = vmatpush3.bf16.msra.mxu0 %v1006_v53 }
 0x1e9   :  { %933 = vmatprep.subr.bf16.mxu0 %v1054_v1 }
 0x1ec   :  { %934 = vmatpush3.bf16.msra.mxu0 %v1007_v54 }
 0x1ed   :  { %935 = vmatprep.subr.bf16.mxu0 %v1054_v1 }
 0x1f0   :  { %936 = vmatpush3.bf16.msra.mxu0 %v1008_v55 }
 0x1f1   :  { %937 = vmatprep.subr.bf16.mxu0 %v1054_v1 }
 0x1f4   :  { %938 = vmatpush3.bf16.msra.mxu0 %v1009_v56 }
 0x1f5   :  { %939 = vmatprep.subr.bf16.mxu0 %v1054_v1 }
 0x1f8   :  { %940 = vmatpush3.bf16.msra.mxu0 %v1010_v0 }
 0x1f9   :  { %941 = vmatprep.subr.bf16.mxu0 %v1054_v1 }
 0x1fc   :  { %942 = vmatpush3.bf16.msra.mxu0 %v1011_v2 }
 0x1fd   :  { %943 = vmatprep.subr.bf16.mxu0 %v1054_v1 }
 0x200   :  { %944 = vmatpush3.bf16.msra.mxu0 %v1012_v3 }
 0x201   :  { %945 = vmatprep.subr.bf16.mxu0 %v1054_v1 }
 0x204   :  { %946 = vmatpush3.bf16.msra.mxu0 %v1013_v4 }
 0x2ba   :  { %v384_v58 = vpop.f32.mrb[4].mxu0 }
 0x2bb   :  { %v385_v59 = vadd.f32 %v761_v57, %v384_v58  ;;  %v909_v60 = vpop.f32.mrb[5].mxu0 }
 0x2bc   :  { %v387_v61 = vpop.f32.mrb[6].mxu0 }
 0x2bd   :  { %v390_v62 = vpack.c.bf16 %v385_v59, %v385_v59  ;;  %v910_v63 = vpop.f32.mrb[7].mxu0 }
 0x2bf   :  { %928 = vmatmul.mubr.bf16.vlgmr.msra.gmra.mrb[4].mxu1 %v390_v62 }
 0x2c0   :  { %967 = vmatprep.mubr.msk.bf16.mxu1 %vm1055_vm0, %v1054_v1  ;;  %952 = vmatpush3.bf16.msra.mxu1 %v1014_v5 }
 0x2c1   :  { %953 = vmatprep.subr.bf16.mxu1 %v1054_v1 }
 0x2c4   :  { %954 = vmatpush3.bf16.msra.mxu1 %v1015_v6 }
 0x2c5   :  { %955 = vmatprep.subr.bf16.mxu1 %v1054_v1 }
 0x2c8   :  { %956 = vmatpush3.bf16.msra.mxu1 %v1016_v7 }
 0x2c9   :  { %957 = vmatprep.subr.bf16.mxu1 %v1054_v1 }
 0x2cc   :  { %958 = vmatpush3.bf16.msra.mxu1 %v1017_v8 }
 0x2cd   :  { %959 = vmatprep.subr.bf16.mxu1 %v1054_v1 }
 0x2d0   :  { %960 = vmatpush3.bf16.msra.mxu1 %v1018_v17 }
 0x2d1   :  { %961 = vmatprep.subr.bf16.mxu1 %v1054_v1 }
 0x2d4   :  { %962 = vmatpush3.bf16.msra.mxu1 %v1019_v18 }
 0x2d5   :  { %963 = vmatprep.subr.bf16.mxu1 %v1054_v1 }
 0x2d8   :  { %964 = vmatpush3.bf16.msra.mxu1 %v1020_v19 }
 0x2d9   :  { %965 = vmatprep.subr.bf16.mxu1 %v1054_v1  ;;  %v788_v1 = vld [vmem:[%s1385_s13] ss:$0 sm:$0xff] }
 0x2dc   :  { %966 = vmatpush3.bf16.msra.mxu1 %v1021_v20 }
 0x392   :  { %v496_v10 = vpop.f32.mrb[4].mxu1 }
 0x393   :  { %v497_v11 = vadd.f32 %v770_v9, %v496_v10  ;;  %v929_v12 = vpop.f32.mrb[5].mxu1 }
 0x394   :  { %v499_v13 = vpop.f32.mrb[6].mxu1 }
 0x395   :  { %1026 = vtanh.f32 %v497_v11  ;;  %v930_v14 = vpop.f32.mrb[7].mxu1 }
 0x39f   :  { %v1027_v15 = vpop.eup %1026 }
 0x3a0   :  { %v503_v16 = vpack.c.bf16 %v1027_v15, %v1027_v15 }
 0x3a2   :  { %948 = vmatmul.mubr.bf16.vlgmr.msra.gmra.mrb[8].mxu0 %v503_v16 }
 0x475   :  { %v609_v22 = vpop.f32.mrb[8].mxu0 }
 0x476   :  { %v610_v23 = vadd.f32 %v779_v21, %v609_v22  ;;  %v949_v24 = vpop.f32.mrb[9].mxu0 }
 0x477   :  { %v612_v25 = vpop.f32.mrb[10].mxu0 }
 0x478   :  { %1028 = vtanh.f32 %v610_v23  ;;  %v950_v26 = vpop.f32.mrb[11].mxu0 }
 0x482   :  { %v1029_v27 = vpop.eup %1028 }
 0x483   :  { %v616_v28 = vpack.c.bf16 %v1029_v27, %v1029_v27 }
 0x485   :  { %968 = vmatmul.mubr.bf16.vlgmr.msra.gmra.mrb[8].mxu1 %v616_v28 }
 0x558   :  { %v722_v29 = vpop.f32.mrb[8].mxu1 }
 0x559   :  { %v723_v30 = vadd.f32 %v788_v1, %v722_v29  ;;  %v969_v31 = vpop.f32.mrb[9].mxu1 }
 0x55a   :  { %v725_v32 = vpop.f32.mrb[10].mxu1 }
 0x55b   :  { %728 = vst [vmem:[#allocation2] sm:$0xff] %v723_v30  ;;  %v970_v33 = vpop.f32.mrb[11].mxu1 }
 0x55c   :  { %1041 = shalt.err (!%p1038_p4)
}
 0x55d   :  { %s1042_s13 = scalar_lea.hbm %s1386_s14, 128 }
 0x55e   :  { %p1043_p5 = scmp.ne.s32.totalorder %s1386_s14, %s1042_s13  ;;  %p1046_p6 = scmp.lt.u32.totalorder %s1042_s13, %s1386_s14 }
 0x560   :  { %p1048_p7 = pnand %p1046_p6, %p1043_p5 }
 0x562   :  { %1051 = shalt.err (!%p1048_p7)
}
 0x563   :  { %738 = dma.vmem_to_hbm [thread:$0]  %s736_s12, 128, %s1386_s14, [#allocation3]  }
 0x564   :  { %1052 = dma.done.wait [#allocation3], 128  }
 0x565   :  { %1053 = vsyncadd [#allocation3], 4294967168 }
 0x566   :  { %742 = vsyncpa [#allocation3], 1 }

</bundles_post_ra>
